<compile_context>
chip_gen: v7x
topology: tpu7x:2x2x1
jax: 0.10.0
libtpu: 0.0.40
codegen_flags: <defaults>
</compile_context>

<pallas_src>
import jax
import jax.numpy as jnp
import numpy as np
from jax.experimental import pallas as pl
from jax.experimental.pallas import tpu as pltpu

# ----------------------------- small config ----------------------------------
BATCH = 2
PAD_SIZE = 8      # pad_size == seq len used here
EMBED = 128       # embed (lane-dense: multiple of 128)
DROPOUT_P = 0.5   # identity at inference


# ----------------------------- kernel -----------------------------------------
def pe_add_kernel(x_ref, pe_ref, o_ref):
    # x_ref: (B, S, D), pe_ref: (S, D), o_ref: (B, S, D) — all fully in VMEM.
    # Single launch, no grid: one VPU add over the whole block, broadcast of
    # the PE table across the (untiled) batch dim is free.
    o_ref[...] = x_ref[...] + pe_ref[...][None, :, :]


# ----------------------------- wrapper ----------------------------------------
def positional_encoding_forward(x, pe):
    """Faithful to `out = x + self.pe[:x.size(1)]; out = self.dropout(out)`."""
    B, S, D = x.shape
    pe_s = pe[:S]  # same as torch `self.pe[:x.size(1)]` (static slice)
    out = pl.pallas_call(
        pe_add_kernel,
        out_shape=jax.ShapeDtypeStruct((B, S, D), x.dtype),
        in_specs=[
            pl.BlockSpec(memory_space=pltpu.MemorySpace.VMEM),  # x  (whole array)
            pl.BlockSpec(memory_space=pltpu.MemorySpace.VMEM),  # pe (whole array)
        ],
        out_specs=pl.BlockSpec(memory_space=pltpu.MemorySpace.VMEM),
    )(x, pe_s)
    # Dropout(p) is identity in eval mode — nothing to do.
    return out


# ----------------------------- deterministic PE table -------------------------
def make_positional_encoding(pad_size, embed):
    # Mirrors the PyTorch init:
    #   pe[pos, i] = pos / 10000 ** ((i // 2) * 2.0 / embed)
    #   even cols -> sin, odd cols -> cos
    pos = np.arange(pad_size, dtype=np.float64)[:, None]
    i = np.arange(embed, dtype=np.float64)[None, :]
    angle = pos / np.power(10000.0, (np.floor(i / 2.0) * 2.0) / embed)
    pe = np.where((np.arange(embed) % 2) == 0, np.sin(angle), np.cos(angle))
    return jnp.asarray(pe, dtype=jnp.float32)


# ----------------------------- pure-JAX reference ------------------------------
def reference_forward(x, pe):
    return x + pe[: x.shape[1]]


# ----------------------------- main --------------------------------------------
if __name__ == "__main__":
    key = jax.random.PRNGKey(0)
    x = jax.random.normal(key, (BATCH, PAD_SIZE, EMBED), dtype=jnp.float32)
    pe = make_positional_encoding(PAD_SIZE, EMBED)

    out = jax.block_until_ready(positional_encoding_forward(x, pe))
    ref = jax.block_until_ready(reference_forward(x, pe))

    assert out.shape == (BATCH, PAD_SIZE, EMBED)
    np.testing.assert_allclose(np.asarray(out), np.asarray(ref), rtol=1e-6, atol=1e-6)

    print("KERNEL_OK")
</pallas_src>

<mosaic_0001>
module attributes {stable_mosaic.version = 11 : i64} {
  func.func @pe_add_kernel(%arg0: memref<2x8x128xf32, #tpu.memory_space<vmem>>, %arg1: memref<8x128xf32, #tpu.memory_space<vmem>>, %arg2: memref<2x8x128xf32, #tpu.memory_space<vmem>>) attributes {dimension_semantics = [], scalar_prefetch = 0 : i64, scratch_operands = 0 : i64, tpu.core_type = #tpu.core_type<tc>} {
    %c0 = arith.constant 0 : index
    %c0_0 = arith.constant 0 : index
    %c0_1 = arith.constant 0 : index
    %0 = vector.load %arg0[%c0, %c0_0, %c0_1] : memref<2x8x128xf32, #tpu.memory_space<vmem>>, vector<2x8x128xf32>
    %c0_2 = arith.constant 0 : index
    %c0_3 = arith.constant 0 : index
    %1 = vector.load %arg1[%c0_2, %c0_3] : memref<8x128xf32, #tpu.memory_space<vmem>>, vector<8x128xf32>
    %2 = vector.shape_cast %1 : vector<8x128xf32> to vector<1x8x128xf32>
    %3 = vector.broadcast %2 : vector<1x8x128xf32> to vector<2x8x128xf32>
    %4 = arith.addf %0, %3 : vector<2x8x128xf32>
    %c0_4 = arith.constant 0 : index
    %c0_5 = arith.constant 0 : index
    %c0_6 = arith.constant 0 : index
    %5 = vector.load %arg2[%c0_4, %c0_5, %c0_6] : memref<2x8x128xf32, #tpu.memory_space<vmem>>, vector<2x8x128xf32>
    tpu.vector_store %arg2[%c0_4, %c0_5, %c0_6], %4 {strides = array<i32>} : memref<2x8x128xf32, #tpu.memory_space<vmem>>, vector<2x8x128xf32>,
    return
  }
}

</mosaic_0001>

<bundles_post_ra>
// kernel: tpu_custom_call.1
= control target key start
LH: loop header
LB: loop body
LE: loop exit
PB: predicated region body
PF: predicated region fallthrough
CT: control target
= control target key end

     0   :  { %7 = vsyncpa [#allocation3], 0  ;;  %s202_s0 = inlined_call_operand.hbm [shape: f32[2,8,128], index: 0, kind: input, shape index: {}]   ;;  %s203_s1 = inlined_call_operand.hbm [shape: f32[8,128], index: 1, kind: input, shape index: {}]   ;;  %s204_s2 = inlined_call_operand.hbm [shape: f32[2,8,128], index: 2, kind: output, shape index: {}]  }
   0x1   :  { %8 = vsyncpa [#allocation6], 0 }
   0x2   :  { %9 = vsyncpa [#allocation4], 0  ;;  %s140_s9 = smov [#allocation2]   ;;  %s68_s13 = scalar_lea.hbm %s202_s0, 256 }
   0x3   :  { %s15_s10 = sshll.u32 %s140_s9, 4  ;;  %p69_p0 = scmp.ne.s32.totalorder %s202_s0, %s68_s13  ;;  %s16_s10 = int_to_ptr.vmem [resolvable:$true] %s15_s10 }
   0x4   :  { %p72_p1 = scmp.lt.u32.totalorder %s68_s13, %s202_s0 }
   0x6   :  { %p74_p2 = pnand %p72_p1, %p69_p0 }
   0x8   :  { %77 = shalt.err (!%p74_p2)
}
   0x9   :  { %s78_s18 = scalar_lea.vmem %s16_s10, 256  ;;  %p83_p4 = scmp.lt.s32.totalorder %s16_s10, %s16_s10 }
   0xa   :  { %p79_p3 = scmp.ne.s32.totalorder %s16_s10, %s78_s18  ;;  %p84_p5 = scmp.lt.s32.totalorder %s78_s18, %s78_s18 }
   0xc   :  { %p85_p6 = por %p84_p5, %p83_p4 }
   0xe   :  { %p86_p7 = pnand %p85_p6, %p79_p3 }
  0x10   :  { %89 = shalt.err (!%p86_p7)
}
  0x11   :  { %s141_s19 = smov 128   ;;  %s142_s20 = smov 8  }
  0x12   :  { %21 = dma.hbm_to_vmem [thread:$0]  %s202_s0, 256, %s16_s10, [#allocation3], %s141_s19, %s141_s19, %s142_s20  }
  0x13   :  { %s143_s23 = smov [#allocation5]   ;;  %s90_s27 = scalar_lea.hbm %s203_s1, 128 }
  0x14   :  { %s28_s24 = sshll.u32 %s143_s23, 4  ;;  %p91_p8 = scmp.ne.s32.totalorder %s203_s1, %s90_s27  ;;  %s29_s24 = int_to_ptr.vmem [resolvable:$true] %s28_s24 }
  0x15   :  { %p94_p9 = scmp.lt.u32.totalorder %s90_s27, %s203_s1 }
  0x17   :  { %p96_p10 = pnand %p94_p9, %p91_p8 }
  0x19   :  { %99 = shalt.err (!%p96_p10)
}
  0x1a   :  { %s100_s4 = scalar_lea.vmem %s29_s24, 128  ;;  %p105_p12 = scmp.lt.s32.totalorder %s29_s24, %s29_s24 }
  0x1b   :  { %p101_p11 = scmp.ne.s32.totalorder %s29_s24, %s100_s4  ;;  %p106_p13 = scmp.lt.s32.totalorder %s100_s4, %s100_s4 }
  0x1d   :  { %p107_p0 = por %p106_p13, %p105_p12 }
  0x1f   :  { %p108_p1 = pnand %p107_p0, %p101_p11 }
  0x21   :  { %111 = shalt.err (!%p108_p1)
}
  0x22   :  { %31 = dma.hbm_to_vmem [thread:$0]  %s203_s1, 128, %s29_s24, [#allocation6]  }
  0x23   :  { %134 = dma.done.wait [#allocation3], 256  }
  0x24   :  { %135 = vsyncadd [#allocation3], 4294967040 }
  0x25   :  { %136 = dma.done.wait [#allocation6], 128  }
  0x26   :  { %137 = vsyncadd [#allocation6], 4294967168  ;;  %s144_s6 = smov [#allocation7]   ;;  %v38_v0 = vld [vmem:[#allocation2] sm:$0xff]  ;;  %v40_v1 = vld [vmem:[#allocation5] sm:$0xff] }
  0x27   :  { %s50_s7 = sshll.u32 %s144_s6, 4  ;;  %v39_v2 = vld [vmem:[#allocation2 + $0x8] sm:$0xff]  ;;  %v41_v3 = vadd.f32 %v40_v1, %v38_v0  ;;  %s51_s7 = int_to_ptr.vmem [resolvable:$true] %s50_s7 }
  0x28   :  { %v42_v4 = vadd.f32 %v40_v1, %v39_v2  ;;  %s112_s8 = scalar_lea.vmem %s51_s7, 256  ;;  %p117_p3 = scmp.lt.s32.totalorder %s51_s7, %s51_s7 }
  0x29   :  { %43 = vst [vmem:[#allocation7] sm:$0xff] %v41_v3  ;;  %p113_p2 = scmp.ne.s32.totalorder %s51_s7, %s112_s8  ;;  %p118_p4 = scmp.lt.s32.totalorder %s112_s8, %s112_s8 }
  0x2a   :  { %44 = vst [vmem:[#allocation7 + $0x8] sm:$0xff] %v42_v4 }
  0x2b   :  { %p119_p5 = por %p118_p4, %p117_p3 }
  0x2d   :  { %p120_p6 = pnand %p119_p5, %p113_p2 }
  0x2f   :  { %123 = shalt.err (!%p120_p6)
}
  0x30   :  { %s124_s10 = scalar_lea.hbm %s204_s2, 256 }
  0x31   :  { %p125_p7 = scmp.ne.s32.totalorder %s204_s2, %s124_s10  ;;  %p128_p8 = scmp.lt.u32.totalorder %s124_s10, %s204_s2 }
  0x33   :  { %p130_p9 = pnand %p128_p8, %p125_p7 }
  0x35   :  { %133 = shalt.err (!%p130_p9)
}
  0x36   :  { %56 = dma.vmem_to_hbm [thread:$0]  %s51_s7, 256, %s204_s2, [#allocation4], %s141_s19, %s141_s19, %s142_s20  }
  0x37   :  { %138 = dma.done.wait [#allocation4], 256  }
  0x38   :  { %139 = vsyncadd [#allocation4], 4294967040 }
  0x39   :  { %60 = vsyncpa [#allocation3], 1 }
  0x3a   :  { %61 = vsyncpa [#allocation6], 1 }
  0x3b   :  { %62 = vsyncpa [#allocation4], 1 }

</bundles_post_ra>
